<compile_context>
chip_gen: v7x
topology: tpu7x:2x2x1
jax: 0.10.0
libtpu: 0.0.40
codegen_flags: <defaults>
</compile_context>

<pallas_src>
import jax
import jax.numpy as jnp
from jax.experimental import pallas as pl
from jax.experimental.pallas import tpu as pltpu


# ----------------------------------------------------------------------------- helpers
def _round_up(x, m):
    return ((x + m - 1) // m) * m


def _cdiv(a, b):
    return (a + b - 1) // b


def _choose_batch_tiling(B, max_tile=1024):
    """Pick (tile, padded_B).

    tile is a multiple of 128 (batch lives in lanes), chosen to minimize
    zero-padding; we require >= 2 grid steps when there is enough work so the
    "parallel" batch axis can shard across v7x's two TensorCores.
    """
    b128 = _round_up(B, 128)
    min_steps = 2 if b128 >= 256 else 1
    lo = max(min_steps, _cdiv(b128, max_tile))
    hi = max(lo, b128 // 128)
    best_key, best_tile = None, 128
    for n in range(lo, hi + 1):
        tile = _round_up(_cdiv(B, n), 128)
        key = (tile * n, n)            # minimize padding, then prefer fewer steps
        if best_key is None or key < best_key:
            best_key, best_tile = key, tile
    return best_tile, best_key[0]


def _vmem_limit_bytes(param_bytes, tile, h4, in_itemsize, out_itemsize):
    """Chip-aware VMEM budget: never exceed 75% of physical capacity."""
    try:
        cap = int(pltpu.get_tpu_info().vmem_capacity_bytes)
    except Exception:
        cap = 64 * 1024 * 1024          # v7x per-TensorCore (most conservative)
    need = (2 * param_bytes                                  # double-buffered resident weights
            + 2 * 8 * tile * (in_itemsize + out_itemsize)    # double-buffered y / out tiles
            + 4 * h4 * tile * 4                              # live f32 activations
            + (4 << 20))                                     # headroom
    return int(min((3 * cap) // 4, max(need, 16 << 20)))


# ----------------------------------------------------------------------------- kernels
def _mlp_tile(x, w1, b1, w2, b2, w3, b3, w4, b4, act_dtype):
    """One evaluation of net(y) on a [features, tile] column block.

    Weights are PyTorch-layout [out, in]; batch is in the lane (last) dim, so
    every intermediate is lane-dense.  Matmul operands use the weights' dtype
    (f32 or bf16), accumulation is f32, bias+tanh run in `act_dtype`.
    """
    cdt = w1.dtype

    def lin(w_ref, h):
        return jnp.dot(w_ref[...], h.astype(cdt), preferred_element_type=jnp.float32)

    def act(h, b_ref):
        return jnp.tanh(h.astype(act_dtype) + b_ref[...].astype(act_dtype))

    h = act(lin(w1, x), b1)            # [H,  tile]
    h = act(lin(w2, h), b2)            # [4H, tile]
    h = act(lin(w3, h), b3)            # [H,  tile]
    return lin(w4, h) + b4[...]        # [in, tile], f32


def _make_odef_kernel(act_dtype):
    def kernel(y_ref, w1, b1, w2, b2, w3, b3, w4, b4, o_ref):
        out = _mlp_tile(y_ref[...], w1, b1, w2, b2, w3, b3, w4, b4, act_dtype)
        o_ref[...] = out.astype(o_ref.dtype)
    return kernel


def _make_rk4_kernel(act_dtype):
    def kernel(dt_ref, y_ref, w1, b1, w2, b2, w3, b3, w4, b4, o_ref):
        dt = dt_ref[0]
        y = y_ref[...].astype(jnp.float32)

        def f(x):
            return _mlp_tile(x, w1, b1, w2, b2, w3, b3, w4, b4, act_dtype)

        k1 = f(y)
        k2 = f(y + (0.5 * dt) * k1)
        k3 = f(y + (0.5 * dt) * k2)
        k4 = f(y + dt * k3)
        o_ref[...] = (y + (dt / 6.0) * (k1 + 2.0 * (k2 + k3) + k4)).astype(o_ref.dtype)
    return kernel


# ----------------------------------------------------------------------------- wrappers
def _run_batched(kernel_factory, scalar_args, scalar_specs, y, params, *,
                 matmul_dtype, activation_dtype, max_batch_tile, n_stages):
    w1, b1, w2, b2, w3, b3, w4, b4 = params
    B, input_dim = y.shape
    H = w1.shape[0]                 # w1: [H, input_dim]  (PyTorch layout [out, in])
    H4 = w2.shape[0]                # w2: [4H, H]

    tile, padded_B = _choose_batch_tiling(B, max_batch_tile)
    grid = (padded_B // tile,)

    mdt = jnp.dtype(matmul_dtype)
    adt = jnp.dtype(activation_dtype)

    # Batch-in-lanes layout: operate on y^T = [input_dim, padded_B].
    y_pad = y if padded_B == B else jnp.pad(y, ((0, padded_B - B), (0, 0)))
    y_t = y_pad.T

    ws = [p.astype(mdt) for p in (w1, w2, w3, w4)]
    bs = [p.astype(jnp.float32).reshape(-1, 1) for p in (b1, b2, b3, b4)]

    def full(shape):
        return pl.BlockSpec(shape, lambda i: (0, 0))    # grid-invariant, VMEM-resident

    in_specs = list(scalar_specs) + [
        pl.BlockSpec((input_dim, tile), lambda i: (0, i)),   # y^T batch tile
        full((H, input_dim)),  full((H, 1)),
        full((H4, H)),         full((H4, 1)),
        full((H, H4)),         full((H, 1)),
        full((input_dim, H)),  full((input_dim, 1)),
    ]
    out_specs = pl.BlockSpec((input_dim, tile), lambda i: (0, i))

    param_bytes = sum(int(p.size) * p.dtype.itemsize for p in ws + bs)
    layer_flops = 2 * padded_B * (input_dim * H + H * H4 + H4 * H + H * input_dim)
    cost = pl.CostEstimate(
        flops=n_stages * layer_flops,
        transcendentals=n_stages * padded_B * (2 * H + H4),
        bytes_accessed=(int(y_t.size) * y_t.dtype.itemsize
                        + padded_B * input_dim * jnp.dtype(y.dtype).itemsize
                        + param_bytes),
    )

    out_t = pl.pallas_call(
        kernel_factory(adt),
        out_shape=jax.ShapeDtypeStruct((input_dim, padded_B), y.dtype),
        grid=grid,
        in_specs=in_specs,
        out_specs=out_specs,
        compiler_params=pltpu.CompilerParams(
            dimension_semantics=("parallel",),
            vmem_limit_bytes=_vmem_limit_bytes(
                param_bytes, tile, H4,
                y_t.dtype.itemsize, jnp.dtype(y.dtype).itemsize),
        ),
        cost_estimate=cost,
    )(*scalar_args, y_t, ws[0], bs[0], ws[1], bs[1], ws[2], bs[2], ws[3], bs[3])

    out = out_t.T
    return out[:B] if padded_B != B else out


def odef_forward(t, y, params, *, matmul_dtype=jnp.float32,
                 activation_dtype=jnp.float32, max_batch_tile=1024):
    """Pallas forward pass of ODEF; `t` is accepted but unused (as in PyTorch).

    matmul_dtype=bf16 halves weight HBM traffic (useful on all chips when
    weight-DMA bound); activation_dtype=bf16 additionally runs bias+tanh on the
    bf16 VPU/EUP path (v6e/v7x only — keep f32 on v5e).  Accumulation is f32.
    """
    del t
    return _run_batched(_make_odef_kernel, (), (), y, params,
                        matmul_dtype=matmul_dtype, activation_dtype=activation_dtype,
                        max_batch_tile=max_batch_tile, n_stages=1)


def odef_rk4_step(t, y, dt, params, *, matmul_dtype=jnp.float32,
                  activation_dtype=jnp.float32, max_batch_tile=1024):
    """One fused RK4 step: y + dt/6 (k1+2k2+2k3+k4), all four net(y) stage
    evaluations inside a single pallas_call so weights stay VMEM-resident."""
    del t
    dt_arr = jnp.asarray(dt, jnp.float32).reshape(1)
    dt_spec = pl.BlockSpec(memory_space=pltpu.MemorySpace.SMEM)
    return _run_batched(_make_rk4_kernel, (dt_arr,), (dt_spec,), y, params,
                        matmul_dtype=matmul_dtype, activation_dtype=activation_dtype,
                        max_batch_tile=max_batch_tile, n_stages=4)


# ----------------------------------------------------------------------------- reference / init
def init_params(key, input_dim, hidden_dim, dtype=jnp.float32):
    """PyTorch-style U(+-1/sqrt(fan_in)) init; weights in PyTorch layout [out, in]."""
    dims = [(hidden_dim, input_dim), (hidden_dim * 4, hidden_dim),
            (hidden_dim, hidden_dim * 4), (input_dim, hidden_dim)]
    params = []
    for (fan_out, fan_in) in dims:
        key, kw, kb = jax.random.split(key, 3)
        bound = 1.0 / (fan_in ** 0.5)
        w = jax.random.uniform(kw, (fan_out, fan_in), dtype, -bound, bound)
        b = jax.random.uniform(kb, (fan_out,), dtype, -bound, bound)
        params.extend([w, b])
    return tuple(params)


_HI = jax.lax.Precision.HIGHEST


def odef_reference(y, params):
    w1, b1, w2, b2, w3, b3, w4, b4 = params
    h = jnp.tanh(jnp.dot(y, w1.T, precision=_HI) + b1)
    h = jnp.tanh(jnp.dot(h, w2.T, precision=_HI) + b2)
    h = jnp.tanh(jnp.dot(h, w3.T, precision=_HI) + b3)
    return jnp.dot(h, w4.T, precision=_HI) + b4


def rk4_reference(y, dt, params):
    f = lambda x: odef_reference(x, params)
    k1 = f(y)
    k2 = f(y + 0.5 * dt * k1)
    k3 = f(y + 0.5 * dt * k2)
    k4 = f(y + dt * k3)
    return y + (dt / 6.0) * (k1 + 2.0 * k2 + 2.0 * k3 + k4)


# ----------------------------------------------------------------------------- demo / checks
if __name__ == "__main__":
    key = jax.random.PRNGKey(0)
    input_dim, hidden_dim = 3, 32          # small shapes consistent with the module
    kp, ky1, ky2 = jax.random.split(key, 3)
    params = init_params(kp, input_dim, hidden_dim)
    t = jnp.float32(0.0)                   # ignored by the module

    # Case 1: small batch (single 128-lane tile), f32.
    y_small = jax.random.normal(ky1, (16, input_dim), jnp.float32)
    out = jax.block_until_ready(odef_forward(t, y_small, params))
    ref = odef_reference(y_small, params)
    assert out.shape == y_small.shape and out.dtype == y_small.dtype
    assert jnp.allclose(out, ref, atol=1e-4, rtol=1e-4), "f32 mismatch vs reference"

    # Case 2: B=384 -> padding-free tiling (tile=128, 3 grid steps), f32.
    y_big = jax.random.normal(ky2, (384, input_dim), jnp.float32)
    out_big = jax.block_until_ready(odef_forward(t, y_big, params))
    ref_big = odef_reference(y_big, params)
    assert out_big.shape == y_big.shape
    assert jnp.allclose(out_big, ref_big, atol=1e-4, rtol=1e-4), "tiled f32 mismatch"

    # Case 3: bf16 matmul operands + bf16 activations (v6e/v7x fast path).
    out_bf16 = jax.block_until_ready(
        odef_forward(t, y_big, params, matmul_dtype=jnp.bfloat16,
                     activation_dtype=jnp.bfloat16))
    assert jnp.allclose(out_bf16, ref_big, atol=1e-1, rtol=1e-1), "bf16 mismatch"

    # Case 4: fused RK4 step (4 net(y) evaluations in one pallas_call).
    dt = 0.05
    out_rk4 = jax.block_until_ready(odef_rk4_step(t, y_big, dt, params))
    ref_rk4 = rk4_reference(y_big, dt, params)
    assert out_rk4.shape == y_big.shape
    assert jnp.allclose(out_rk4, ref_rk4, atol=1e-4, rtol=1e-4), "RK4 mismatch"

    print("KERNEL_OK")
</pallas_src>

<mosaic_0001>
module attributes {stable_mosaic.version = 11 : i64} {
  func.func @kernel(%arg0: i32, %arg1: memref<3x128xf32, #tpu.memory_space<vmem>>, %arg2: memref<32x3xf32, #tpu.memory_space<vmem>>, %arg3: memref<32x1xf32, #tpu.memory_space<vmem>>, %arg4: memref<128x32xf32, #tpu.memory_space<vmem>>, %arg5: memref<128x1xf32, #tpu.memory_space<vmem>>, %arg6: memref<32x128xf32, #tpu.memory_space<vmem>>, %arg7: memref<32x1xf32, #tpu.memory_space<vmem>>, %arg8: memref<3x32xf32, #tpu.memory_space<vmem>>, %arg9: memref<3x1xf32, #tpu.memory_space<vmem>>, %arg10: memref<3x128xf32, #tpu.memory_space<vmem>>) attributes {dimension_semantics = [#tpu.dimension_semantics<parallel>], iteration_bounds = array<i64: 1>, scalar_prefetch = 0 : i64, scratch_operands = 0 : i64, tpu.core_type = #tpu.core_type<tc>, window_params = [{transform_indices = @transform_0, window_bounds = array<i64: 3, 128>}, {pipeline_mode = #tpu.pipeline_mode<synchronous>, transform_indices = @transform_1, window_bounds = array<i64: 32, 3>}, {pipeline_mode = #tpu.pipeline_mode<synchronous>, transform_indices = @transform_2, window_bounds = array<i64: 32, 1>}, {pipeline_mode = #tpu.pipeline_mode<synchronous>, transform_indices = @transform_3, window_bounds = array<i64: 128, 32>}, {pipeline_mode = #tpu.pipeline_mode<synchronous>, transform_indices = @transform_4, window_bounds = array<i64: 128, 1>}, {pipeline_mode = #tpu.pipeline_mode<synchronous>, transform_indices = @transform_5, window_bounds = array<i64: 32, 128>}, {pipeline_mode = #tpu.pipeline_mode<synchronous>, transform_indices = @transform_6, window_bounds = array<i64: 32, 1>}, {pipeline_mode = #tpu.pipeline_mode<synchronous>, transform_indices = @transform_7, window_bounds = array<i64: 3, 32>}, {pipeline_mode = #tpu.pipeline_mode<synchronous>, transform_indices = @transform_8, window_bounds = array<i64: 3, 1>}, {transform_indices = @transform_9, window_bounds = array<i64: 3, 128>}]} {
    %c0 = arith.constant 0 : index
    %c0_0 = arith.constant 0 : index
    %0 = vector.load %arg1[%c0, %c0_0] : memref<3x128xf32, #tpu.memory_space<vmem>>, vector<3x128xf32>
    %c0_1 = arith.constant 0 : index
    %c0_2 = arith.constant 0 : index
    %1 = vector.load %arg2[%c0_1, %c0_2] : memref<32x3xf32, #tpu.memory_space<vmem>>, vector<32x3xf32>
    %cst = arith.constant dense<0.000000e+00> : vector<32x128xf32>
    %2 = tpu.matmul %1, %0, %cst {dimension_numbers = #tpu.dot_dimension_numbers<[1], [0], [0], [1], [0, 0, 1, 1], [], []>} : vector<32x3xf32>, vector<3x128xf32>, vector<32x128xf32> -> vector<32x128xf32>
    %c0_3 = arith.constant 0 : index
    %c0_4 = arith.constant 0 : index
    %3 = vector.load %arg3[%c0_3, %c0_4] : memref<32x1xf32, #tpu.memory_space<vmem>>, vector<32x1xf32>
    %4 = vector.broadcast %3 : vector<32x1xf32> to vector<32x128xf32>
    %5 = arith.addf %2, %4 : vector<32x128xf32>
    %6 = math.tanh %5 : vector<32x128xf32>
    %c0_5 = arith.constant 0 : index
    %c0_6 = arith.constant 0 : index
    %7 = vector.load %arg4[%c0_5, %c0_6] : memref<128x32xf32, #tpu.memory_space<vmem>>, vector<128x32xf32>
    %cst_7 = arith.constant dense<0.000000e+00> : vector<128x128xf32>
    %8 = tpu.matmul %7, %6, %cst_7 {dimension_numbers = #tpu.dot_dimension_numbers<[1], [0], [0], [1], [0, 0, 1, 1], [], []>} : vector<128x32xf32>, vector<32x128xf32>, vector<128x128xf32> -> vector<128x128xf32>
    %c0_8 = arith.constant 0 : index
    %c0_9 = arith.constant 0 : index
    %9 = vector.load %arg5[%c0_8, %c0_9] : memref<128x1xf32, #tpu.memory_space<vmem>>, vector<128x1xf32>
    %10 = vector.broadcast %9 : vector<128x1xf32> to vector<128x128xf32>
    %11 = arith.addf %8, %10 : vector<128x128xf32>
    %12 = math.tanh %11 : vector<128x128xf32>
    %c0_10 = arith.constant 0 : index
    %c0_11 = arith.constant 0 : index
    %13 = vector.load %arg6[%c0_10, %c0_11] : memref<32x128xf32, #tpu.memory_space<vmem>>, vector<32x128xf32>
    %cst_12 = arith.constant dense<0.000000e+00> : vector<32x128xf32>
    %14 = tpu.matmul %13, %12, %cst_12 {dimension_numbers = #tpu.dot_dimension_numbers<[1], [0], [0], [1], [0, 0, 1, 1], [], []>} : vector<32x128xf32>, vector<128x128xf32>, vector<32x128xf32> -> vector<32x128xf32>
    %c0_13 = arith.constant 0 : index
    %c0_14 = arith.constant 0 : index
    %15 = vector.load %arg7[%c0_13, %c0_14] : memref<32x1xf32, #tpu.memory_space<vmem>>, vector<32x1xf32>
    %16 = vector.broadcast %15 : vector<32x1xf32> to vector<32x128xf32>
    %17 = arith.addf %14, %16 : vector<32x128xf32>
    %18 = math.tanh %17 : vector<32x128xf32>
    %c0_15 = arith.constant 0 : index
    %c0_16 = arith.constant 0 : index
    %19 = vector.load %arg8[%c0_15, %c0_16] : memref<3x32xf32, #tpu.memory_space<vmem>>, vector<3x32xf32>
    %cst_17 = arith.constant dense<0.000000e+00> : vector<3x128xf32>
    %20 = tpu.matmul %19, %18, %cst_17 {dimension_numbers = #tpu.dot_dimension_numbers<[1], [0], [0], [1], [0, 0, 1, 1], [], []>} : vector<3x32xf32>, vector<32x128xf32>, vector<3x128xf32> -> vector<3x128xf32>
    %c0_18 = arith.constant 0 : index
    %c0_19 = arith.constant 0 : index
    %21 = vector.load %arg9[%c0_18, %c0_19] : memref<3x1xf32, #tpu.memory_space<vmem>>, vector<3x1xf32>
    %22 = vector.broadcast %21 : vector<3x1xf32> to vector<3x128xf32>
    %23 = arith.addf %20, %22 : vector<3x128xf32>
    %c0_20 = arith.constant 0 : index
    %c0_21 = arith.constant 0 : index
    %24 = vector.load %arg10[%c0_20, %c0_21] : memref<3x128xf32, #tpu.memory_space<vmem>>, vector<3x128xf32>
    tpu.vector_store %arg10[%c0_20, %c0_21], %23 {strides = array<i32>} : memref<3x128xf32, #tpu.memory_space<vmem>>, vector<3x128xf32>,
    return
  }
  func.func @transform_0(%arg0: i32) -> (i32, i32) {
    %c0_i32 = arith.constant 0 : i32
    %c0_i32_0 = arith.constant 0 : i32
    return %c0_i32, %arg0 : i32, i32
  }
  func.func @transform_1(%arg0: i32) -> (i32, i32) {
    %c0_i32 = arith.constant 0 : i32
    %c0_i32_0 = arith.constant 0 : i32
    %c0_i32_1 = arith.constant 0 : i32
    return %c0_i32, %c0_i32_0 : i32, i32
  }
  func.func @transform_2(%arg0: i32) -> (i32, i32) {
    %c0_i32 = arith.constant 0 : i32
    %c0_i32_0 = arith.constant 0 : i32
    %c0_i32_1 = arith.constant 0 : i32
    return %c0_i32, %c0_i32_0 : i32, i32
  }
  func.func @transform_3(%arg0: i32) -> (i32, i32) {
    %c0_i32 = arith.constant 0 : i32
    %c0_i32_0 = arith.constant 0 : i32
    %c0_i32_1 = arith.constant 0 : i32
    return %c0_i32, %c0_i32_0 : i32, i32
  }
  func.func @transform_4(%arg0: i32) -> (i32, i32) {
    %c0_i32 = arith.constant 0 : i32
    %c0_i32_0 = arith.constant 0 : i32
    %c0_i32_1 = arith.constant 0 : i32
    return %c0_i32, %c0_i32_0 : i32, i32
  }
  func.func @transform_5(%arg0: i32) -> (i32, i32) {
    %c0_i32 = arith.constant 0 : i32
    %c0_i32_0 = arith.constant 0 : i32
    %c0_i32_1 = arith.constant 0 : i32
    return %c0_i32, %c0_i32_0 : i32, i32
  }
  func.func @transform_6(%arg0: i32) -> (i32, i32) {
    %c0_i32 = arith.constant 0 : i32
    %c0_i32_0 = arith.constant 0 : i32
    %c0_i32_1 = arith.constant 0 : i32
    return %c0_i32, %c0_i32_0 : i32, i32
  }
  func.func @transform_7(%arg0: i32) -> (i32, i32) {
    %c0_i32 = arith.constant 0 : i32
    %c0_i32_0 = arith.constant 0 : i32
    %c0_i32_1 = arith.constant 0 : i32
    return %c0_i32, %c0_i32_0 : i32, i32
  }
  func.func @transform_8(%arg0: i32) -> (i32, i32) {
    %c0_i32 = arith.constant 0 : i32
    %c0_i32_0 = arith.constant 0 : i32
    %c0_i32_1 = arith.constant 0 : i32
    return %c0_i32, %c0_i32_0 : i32, i32
  }
  func.func @transform_9(%arg0: i32) -> (i32, i32) {
    %c0_i32 = arith.constant 0 : i32
    %c0_i32_0 = arith.constant 0 : i32
    return %c0_i32, %arg0 : i32, i32
  }
}

</mosaic_0001>

<bundles_post_ra>
// kernel: tpu_custom_call.1
= control target key start
LH: loop header
LB: loop body
LE: loop exit
PB: predicated region body
PF: predicated region fallthrough
CT: control target
= control target key end

     0   :  { %vm75_vm0 = vcmask 1042432   ;;  %vm62_vm1 = vcmask 23552   ;;  %v988_v5 = vmov 0   ;;  %s1229_s0 = inlined_call_operand.vmem [shape: f32[3,128], index: 0, kind: input, shape index: {}]   ;;  %s1230_s1 = inlined_call_operand.vmem [shape: f32[32,3], index: 1, kind: input, shape index: {}]   ;;  %s1231_s2 = inlined_call_operand.vmem [shape: f32[32,1], index: 2, kind: input, shape index: {}]   ;;  %s1232_s3 = inlined_call_operand.vmem [shape: f32[128,32], index: 3, kind: input, shape index: {}]   ;;  %s1233_s4 = inlined_call_operand.vmem [shape: f32[128,1], index: 4, kind: input, shape index: {}]   ;;  %s1234_s5 = inlined_call_operand.vmem [shape: f32[32,128], index: 5, kind: input, shape index: {}]   ;;  %s1235_s6 = inlined_call_operand.vmem [shape: f32[32,1], index: 6, kind: input, shape index: {}]   ;;  %s1236_s7 = inlined_call_operand.vmem [shape: f32[3,32], index: 7, kind: input, shape index: {}]   ;;  %s1237_s8 = inlined_call_operand.vmem [shape: f32[3,1], index: 8, kind: input, shape index: {}]   ;;  %s1238_s9 = inlined_call_operand.hbm [shape: f32[3,128], index: 9, kind: output, shape index: {}]  }
   0x1   :  { %v33_v0 = vld [vmem:[%s1229_s0] sm:$0x7]  ;;  %v35_v2 = vld [vmem:[%s1230_s1 + $0x8] sm:$0xff]  ;;  %v36_v3 = vld [vmem:[%s1230_s1 + $0x10] sm:$0xff]  ;;  %914 = vset.pattern.permute.xlu0 %v988_v5  ;;  %915 = vset.pattern.permute.xlu1 %v988_v5 }
   0x2   :  { %v34_v1 = vld [vmem:[%s1230_s1] sm:$0xff]  ;;  %774 = vmatprep.subr.msk.mxu0 %vm75_vm0, %v33_v0  ;;  %v40_v6 = vld [vmem:[%s1231_s2 + $0x10] sm:$0xff]  ;;  %v37_v7 = vld [vmem:[%s1230_s1 + $0x18] sm:$0xff] }
   0x3   :  { %776 = vmatprep.mubr.msk.f32.mxu0 %vm62_vm1, %v34_v1  ;;  %v38_v4 = vld [vmem:[%s1231_s2] sm:$0xff]  ;;  %775 = vmatpush3.msk.msra.mxu0 %vm75_vm0, %v33_v0  ;;  %v39_v8 = vld [vmem:[%s1231_s2 + $0x8] sm:$0xff]  ;;  %v41_v9 = vld [vmem:[%s1231_s2 + $0x18] sm:$0xff] }
   0x4   :  { %777 = vmatmul.mubr.msk.f32.vlgmr.msra.gmra.mrb[0].mxu0 %vm62_vm1, %v35_v2  ;;  %44 = vperm.xlu0 %914, %v38_v4   ;;  %v184_v10 = vld [vmem:[%s1233_s4] sm:$0xff]  ;;  %v185_v11 = vld [vmem:[%s1233_s4 + $0x8] sm:$0xff] }
   0x5   :  { %779 = vmatprep.mubr.msk.f32.mxu0 %vm62_vm1, %v36_v3  ;;  %54 = vperm.xlu1 %915, %v40_v6  }
   0x8   :  { %780 = vmatmul.mubr.msk.f32.gmra.mrb[2].mxu0 %vm62_vm1, %v37_v7  ;;  %49 = vperm.xlu0 %914, %v39_v8  }
   0x9   :  { %59 = vperm.xlu1 %915, %v41_v9  }
   0xa   :  { %14 = vsyncpa [#allocation3], 0  ;;  %v186_v12 = vld [vmem:[%s1233_s4 + $0x10] sm:$0xff]  ;;  %v187_v13 = vld [vmem:[%s1233_s4 + $0x18] sm:$0xff]  ;;  %vm280_vm2 = vcmask 261120   ;;  %vm990_vm3 = vmmov 0  }
   0xb   :  { %v188_v14 = vld [vmem:[%s1233_s4 + $0x20] sm:$0xff]  ;;  %v189_v15 = vld [vmem:[%s1233_s4 + $0x28] sm:$0xff]  ;;  %v190_v16 = vld [vmem:[%s1233_s4 + $0x30] sm:$0xff]  ;;  %s992_s29 = smov [#allocation2]  }
   0xc   :  { %202 = vperm.xlu0 %914, %v184_v10   ;;  %v191_v17 = vld [vmem:[%s1233_s4 + $0x38] sm:$0xff]  ;;  %v192_v18 = vld [vmem:[%s1233_s4 + $0x40] sm:$0xff]  ;;  %v193_v19 = vld [vmem:[%s1233_s4 + $0x48] sm:$0xff]  ;;  %s694_s30 = sshll.u32 %s992_s29, 4  ;;  %s695_s30 = int_to_ptr.vmem [resolvable:$true] %s694_s30 }
   0xd   :  { %207 = vperm.xlu1 %915, %v185_v11   ;;  %v194_v20 = vld [vmem:[%s1233_s4 + $0x50] sm:$0xff]  ;;  %v195_v21 = vld [vmem:[%s1233_s4 + $0x58] sm:$0xff]  ;;  %v196_v22 = vld [vmem:[%s1233_s4 + $0x60] sm:$0xff]  ;;  %s964_s2 = scalar_lea.vmem %s695_s30, 64  ;;  %p969_p1 = scmp.lt.s32.totalorder %s695_s30, %s695_s30 }
   0xe   :  { %v197_v23 = vld [vmem:[%s1233_s4 + $0x68] sm:$0xff]  ;;  %v198_v24 = vld [vmem:[%s1233_s4 + $0x70] sm:$0xff]  ;;  %v199_v25 = vld [vmem:[%s1233_s4 + $0x78] sm:$0xff]  ;;  %p965_p0 = scmp.ne.s32.totalorder %s695_s30, %s964_s2  ;;  %p970_p2 = scmp.lt.s32.totalorder %s964_s2, %s964_s2 }
   0xf   :  { %v494_v26 = vld [vmem:[%s1235_s6] sm:$0xff]  ;;  %v495_v27 = vld [vmem:[%s1235_s6 + $0x8] sm:$0xff]  ;;  %v496_v28 = vld [vmem:[%s1235_s6 + $0x10] sm:$0xff] }
  0x10   :  { %212 = vperm.xlu0 %914, %v186_v12   ;;  %v497_v29 = vld [vmem:[%s1235_s6 + $0x18] sm:$0xff]  ;;  %v608_v30 = vld [vmem:[%s1237_s8] sm:$0x7]  ;;  %v169_v50 = vld [vmem:[%s1232_s3 + $0x8] sm:$0xff]  ;;  %p971_p3 = por %p970_p2, %p969_p1 }
  0x11   :  { %217 = vperm.xlu1 %915, %v187_v13   ;;  %v168_v31 = vld [vmem:[%s1232_s3] sm:$0xff]  ;;  %v170_v51 = vld [vmem:[%s1232_s3 + $0x10] sm:$0xff]  ;;  %v171_v52 = vld [vmem:[%s1232_s3 + $0x18] sm:$0xff] }
  0x12   :  { %790 = vmatprep.mubr.msk.f32.mxu1 %vm280_vm2, %v168_v31  ;;  %v172_v53 = vld [vmem:[%s1232_s3 + $0x20] sm:$0xff]  ;;  %v173_v54 = vld [vmem:[%s1232_s3 + $0x28] sm:$0xff]  ;;  %v174_v55 = vld [vmem:[%s1232_s3 + $0x30] sm:$0xff]  ;;  %p972_p4 = pnand %p971_p3, %p965_p0 }
  0x13   :  { %v175_v56 = vld [vmem:[%s1232_s3 + $0x38] sm:$0xff]  ;;  %v176_v57 = vld [vmem:[%s1232_s3 + $0x40] sm:$0xff]  ;;  %v177_v58 = vld [vmem:[%s1232_s3 + $0x48] sm:$0xff] }
  0x14   :  { %222 = vperm.xlu0 %914, %v188_v14   ;;  %v178_v59 = vld [vmem:[%s1232_s3 + $0x50] sm:$0xff]  ;;  %v179_v60 = vld [vmem:[%s1232_s3 + $0x58] sm:$0xff]  ;;  %v180_v61 = vld [vmem:[%s1232_s3 + $0x60] sm:$0xff] }
  0x15   :  { %227 = vperm.xlu1 %915, %v189_v15   ;;  %v181_v62 = vld [vmem:[%s1232_s3 + $0x68] sm:$0xff]  ;;  %v182_v63 = vld [vmem:[%s1232_s3 + $0x70] sm:$0xff]  ;;  %v183_v0 = vld [vmem:[%s1232_s3 + $0x78] sm:$0xff] }
  0x16   :  { %v490_v1 = vld [vmem:[%s1234_s5] sm:$0xff] }
  0x17   :  { %846 = vmatprep.mubr.f32.mxu0 %v490_v1 }
  0x18   :  { %232 = vperm.xlu0 %914, %v190_v16  }
  0x19   :  { %237 = vperm.xlu1 %915, %v191_v17  }
  0x1c   :  { %242 = vperm.xlu0 %914, %v192_v18  }
  0x1d   :  { %247 = vperm.xlu1 %915, %v193_v19  }
  0x20   :  { %252 = vperm.xlu0 %914, %v194_v20  }
  0x21   :  { %257 = vperm.xlu1 %915, %v195_v21  }
  0x24   :  { %262 = vperm.xlu0 %914, %v196_v22  }
  0x25   :  { %267 = vperm.xlu1 %915, %v197_v23  }
  0x28   :  { %272 = vperm.xlu0 %914, %v198_v24  }
  0x29   :  { %277 = vperm.xlu1 %915, %v199_v25  }
  0x2c   :  { %500 = vperm.xlu0 %914, %v494_v26  }
  0x2d   :  { %505 = vperm.xlu1 %915, %v495_v27  }
  0x30   :  { %510 = vperm.xlu0 %914, %v496_v28  }
  0x31   :  { %515 = vperm.xlu1 %915, %v497_v29  }
  0x34   :  { %611 = vperm.xlu0 %914, %v608_v30  }
  0x83   :  { %v45_v32 = vpop.permute.xlu0 %44 }
  0x84   :  { %v55_v33 = vpop.permute.xlu1 %54 }
  0x87   :  { %v50_v34 = vpop.permute.xlu0 %49 }
  0x88   :  { %v60_v39 = vpop.permute.xlu1 %59 }
  0x8b   :  { %v203_v3 = vpop.permute.xlu0 %202 }
  0x8c   :  { %v208_v2 = vpop.permute.xlu1 %207 }
  0x8f   :  { %v213_v5 = vpop.permute.xlu0 %212 }
  0x90   :  { %v218_v4 = vpop.permute.xlu1 %217 }
  0x93   :  { %v223_v7 = vpop.permute.xlu0 %222 }
  0x94   :  { %v228_v6 = vpop.permute.xlu1 %227 }
  0x97   :  { %v233_v14 = vpop.permute.xlu0 %232 }
  0x98   :  { %v238_v12 = vpop.permute.xlu1 %237 }
  0x9b   :  { %v243_v23 = vpop.permute.xlu0 %242 }
  0x9c   :  { %v248_v21 = vpop.permute.xlu1 %247 }
  0xa0   :  { %v258_v31 = vpop.permute.xlu1 %257 }
  0xd7   :  { %v778_v35 = vpop.f32.mrb[0].mxu0 }
  0xd8   :  { %v151_v36 = vadd.f32 %v778_v35, %v50_v34  ;;  %v145_v37 = vpop.f32.mrb[1].mxu0  ;;  %v253_v34 = vpop.permute.xlu0 %252 }
  0xd9   :  { %v146_v38 = vadd.f32 %v145_v37, %v45_v32 }
  0xda   :  { %916 = vtanh.f32 %v151_v36 }
  0xdb   :  { %918 = vtanh.f32 %v146_v38  ;;  %v781_v40 = vpop.f32.mrb[2].mxu0 }
  0xdc   :  { %v161_v41 = vadd.f32 %v781_v40, %v60_v39  ;;  %v155_v42 = vpop.f32.mrb[3].mxu0 }
  0xdd   :  { %v156_v43 = vadd.f32 %v155_v42, %v55_v33 }
  0xde   :  { %920 = vtanh.f32 %v161_v41 }
  0xdf   :  { %922 = vtanh.f32 %v156_v43 }
  0xe4   :  { %v917_v44 = vpop.eup %916 }
  0xe5   :  { %v919_v45 = vpop.eup %918 }
  0xe6   :  { %v863_v46 = vpack.c.bf16 %v917_v44, %v919_v45  ;;  %v268_v45 = vpop.permute.xlu1 %267 }
  0xe8   :  { %v921_v47 = vpop.eup %920  ;;  %864 = vmatprep.subr.bf16.mxu1 %v863_v46 }
  0xe9   :  { %v923_v48 = vpop.eup %922  ;;  %866 = vmatpush3.bf16.msra.mxu1 %v863_v46 }
  0xea   :  { %v867_v49 = vpack.c.bf16 %v921_v47, %v923_v48  ;;  %v263_v47 = vpop.permute.xlu0 %262 }
  0xec   :  { %868 = vmatprep.subr.bf16.mxu1 %v867_v49 }
  0xed   :  { %870 = vmatpush3.bf16.msra.mxu1 %v867_v49 }
  0xf0   :  { %791 = vmatmul.mubr.msk.f32.vlgmr.msra.gmra.mrb[0].mxu1 %vm280_vm2, %v169_v50 }
  0xf1   :  { %793 = vmatprep.mubr.msk.f32.mxu1 %vm280_vm2, %v170_v51 }
  0xf4   :  { %794 = vmatmul.mubr.msk.f32.gmra.mrb[2].mxu1 %vm280_vm2, %v171_v52 }
  0xf5   :  { %796 = vmatprep.mubr.msk.f32.mxu1 %vm280_vm2, %v172_v53 }
  0xf8   :  { %797 = vmatmul.mubr.msk.f32.gmra.mrb[4].mxu1 %vm280_vm2, %v173_v54 }
  0xf9   :  { %799 = vmatprep.mubr.msk.f32.mxu1 %vm280_vm2, %v174_v55 }
  0xfc   :  { %800 = vmatmul.mubr.msk.f32.gmra.mrb[6].mxu1 %vm280_vm2, %v175_v56  ;;  %v278_v56 = vpop.permute.xlu1 %277 }
  0xfd   :  { %802 = vmatprep.mubr.msk.f32.mxu1 %vm280_vm2, %v176_v57 }
 0x100   :  { %803 = vmatmul.mubr.msk.f32.gmra.mrb[8].mxu1 %vm280_vm2, %v177_v58 }
 0x101   :  { %805 = vmatprep.mubr.msk.f32.mxu1 %vm280_vm2, %v178_v59  ;;  %v273_v59 = vpop.permute.xlu0 %272 }
 0x104   :  { %806 = vmatmul.mubr.msk.f32.gmra.mrb[10].mxu1 %vm280_vm2, %v179_v60 }
 0x105   :  { %808 = vmatprep.mubr.msk.f32.mxu1 %vm280_vm2, %v180_v61 }
 0x108   :  { %809 = vmatmul.mubr.msk.f32.gmra.mrb[12].mxu1 %vm280_vm2, %v181_v62 }
 0x109   :  { %811 = vmatprep.mubr.msk.f32.mxu1 %vm280_vm2, %v182_v63 }
 0x10c   :  { %812 = vmatmul.mubr.msk.f32.gmra.mrb[14].mxu1 %vm280_vm2, %v183_v0 }
 0x1c3   :  { %v792_v8 = vpop.f32.mrb[0].mxu1 }
 0x1c4   :  { %v401_v9 = vadd.f32 %v792_v8, %v208_v2  ;;  %v395_v10 = vpop.f32.mrb[1].mxu1 }
 0x1c5   :  { %v396_v11 = vadd.f32 %v395_v10, %v203_v3  ;;  %v491_v10 = vld [vmem:[%s1234_s5 + $0x8] sm:$0xff] }
 0x1c6   :  { %924 = vtanh.f32 %v401_v9 }
 0x1c7   :  { %926 = vtanh.f32 %v396_v11  ;;  %v795_v13 = vpop.f32.mrb[2].mxu1  ;;  %v492_v11 = vld [vmem:[%s1234_s5 + $0x10] sm:$0xff] }
 0x1c8   :  { %v411_v15 = vadd.f32 %v795_v13, %v218_v4  ;;  %v405_v16 = vpop.f32.mrb[3].mxu1  ;;  %v989_v13 = vmov 0.0|0.0  }
 0x1c9   :  { %v406_v17 = vadd.f32 %v405_v16, %v213_v5  ;;  %903 = vmatprep.subr.bf16.mxu1 %v989_v13  ;;  %v501_v16 = vpop.permute.xlu0 %500 }
 0x1ca   :  { %928 = vtanh.f32 %v411_v15  ;;  %v506_v15 = vpop.permute.xlu1 %505 }
 0x1cb   :  { %930 = vtanh.f32 %v406_v17  ;;  %v798_v18 = vpop.f32.mrb[4].mxu1 }
 0x1cc   :  { %v421_v19 = vadd.f32 %v798_v18, %v228_v6  ;;  %v415_v20 = vpop.f32.mrb[5].mxu1 }
 0x1cd   :  { %v416_v22 = vadd.f32 %v415_v20, %v223_v7 }
 0x1ce   :  { %932 = vtanh.f32 %v421_v19 }
 0x1cf   :  { %934 = vtanh.f32 %v416_v22  ;;  %v801_v24 = vpop.f32.mrb[6].mxu1 }
 0x1d0   :  { %v925_v25 = vpop.eup %924  ;;  %v431_v26 = vadd.f32 %v801_v24, %v238_v12  ;;  %v425_v27 = vpop.f32.mrb[7].mxu1  ;;  %v493_v12 = vld [vmem:[%s1234_s5 + $0x18] sm:$0xff] }
 0x1d1   :  { %v927_v28 = vpop.eup %926  ;;  %v426_v29 = vadd.f32 %v425_v27, %v233_v14  ;;  %v991_v14 = vmov 0.0  }
 0x1d2   :  { %936 = vtanh.f32 %v431_v26  ;;  %v871_v30 = vpack.c.bf16 %v925_v25, %v927_v28  ;;  %860 = vmatprep.mubr.msk.f32.mxu1 %vm990_vm3, %v991_v14 }
 0x1d3   :  { %938 = vtanh.f32 %v426_v29  ;;  %v804_v32 = vpop.f32.mrb[8].mxu1 }
 0x1d4   :  { %v929_v33 = vpop.eup %928  ;;  %v441_v35 = vadd.f32 %v804_v32, %v248_v21  ;;  %v435_v36 = vpop.f32.mrb[9].mxu1  ;;  %872 = vmatprep.subr.bf16.mxu0 %v871_v30 }
 0x1d5   :  { %v931_v37 = vpop.eup %930  ;;  %v436_v38 = vadd.f32 %v435_v36, %v243_v23  ;;  %874 = vmatpush3.bf16.msra.mxu0 %v871_v30  ;;  %v516_v21 = vpop.permute.xlu1 %515 }
 0x1d6   :  { %940 = vtanh.f32 %v441_v35  ;;  %v875_v39 = vpack.c.bf16 %v929_v33, %v931_v37  ;;  %v511_v23 = vpop.permute.xlu0 %510  ;;  %v607_v33 = vld [vmem:[%s1236_s7] sm:$0x7] }
 0x1d7   :  { %942 = vtanh.f32 %v436_v38  ;;  %v807_v40 = vpop.f32.mrb[10].mxu1 }
 0x1d8   :  { %v933_v41 = vpop.eup %932  ;;  %v451_v42 = vadd.f32 %v807_v40, %v258_v31  ;;  %v445_v43 = vpop.f32.mrb[11].mxu1  ;;  %876 = vmatprep.subr.bf16.mxu0 %v875_v39 }
 0x1d9   :  { %v935_v44 = vpop.eup %934  ;;  %v446_v46 = vadd.f32 %v445_v43, %v253_v34  ;;  %878 = vmatpush3.bf16.msra.mxu0 %v875_v39 }
 0x1da   :  { %944 = vtanh.f32 %v451_v42  ;;  %v879_v48 = vpack.c.bf16 %v933_v41, %v935_v44  ;;  %v612_v34 = vpop.permute.xlu0 %611 }
 0x1db   :  { %946 = vtanh.f32 %v446_v46  ;;  %v810_v49 = vpop.f32.mrb[12].mxu1 }
 0x1dc   :  { %v937_v50 = vpop.eup %936  ;;  %v461_v51 = vadd.f32 %v810_v49, %v268_v45  ;;  %v455_v52 = vpop.f32.mrb[13].mxu1  ;;  %880 = vmatprep.subr.bf16.mxu0 %v879_v48 }
 0x1dd   :  { %v939_v53 = vpop.eup %938  ;;  %v456_v54 = vadd.f32 %v455_v52, %v263_v47  ;;  %882 = vmatpush3.bf16.msra.mxu0 %v879_v48 }
 0x1de   :  { %948 = vtanh.f32 %v461_v51  ;;  %v883_v55 = vpack.c.bf16 %v937_v50, %v939_v53 }
 0x1df   :  { %950 = vtanh.f32 %v456_v54  ;;  %v813_v57 = vpop.f32.mrb[14].mxu1 }
 0x1e0   :  { %v941_v58 = vpop.eup %940  ;;  %v471_v60 = vadd.f32 %v813_v57, %v278_v56  ;;  %v465_v61 = vpop.f32.mrb[15].mxu1  ;;  %884 = vmatprep.subr.bf16.mxu0 %v883_v55 }
 0x1e1   :  { %v943_v62 = vpop.eup %942  ;;  %v466_v63 = vadd.f32 %v465_v61, %v273_v59  ;;  %886 = vmatpush3.bf16.msra.mxu0 %v883_v55 }
 0x1e2   :  { %952 = vtanh.f32 %v471_v60  ;;  %v887_v0 = vpack.c.bf16 %v941_v58, %v943_v62 }
 0x1e3   :  { %954 = vtanh.f32 %v466_v63 }
 0x1e4   :  { %v945_v1 = vpop.eup %944  ;;  %888 = vmatprep.subr.bf16.mxu0 %v887_v0 }
 0x1e5   :  { %v947_v2 = vpop.eup %946  ;;  %890 = vmatpush3.bf16.msra.mxu0 %v887_v0 }
 0x1e6   :  { %v891_v3 = vpack.c.bf16 %v945_v1, %v947_v2 }
 0x1e8   :  { %v949_v4 = vpop.eup %948  ;;  %892 = vmatprep.subr.bf16.mxu0 %v891_v3 }
 0x1e9   :  { %v951_v5 = vpop.eup %950  ;;  %894 = vmatpush3.bf16.msra.mxu0 %v891_v3 }
 0x1ea   :  { %v895_v6 = vpack.c.bf16 %v949_v4, %v951_v5 }
 0x1ec   :  { %v953_v7 = vpop.eup %952  ;;  %896 = vmatprep.subr.bf16.mxu0 %v895_v6 }
 0x1ed   :  { %v955_v8 = vpop.eup %954  ;;  %898 = vmatpush3.bf16.msra.mxu0 %v895_v6 }
 0x1ee   :  { %v899_v9 = vpack.c.bf16 %v953_v7, %v955_v8 }
 0x1f0   :  { %900 = vmatprep.subr.bf16.mxu0 %v899_v9 }
 0x1f1   :  { %902 = vmatpush3.bf16.msra.mxu0 %v899_v9 }
 0x1f4   :  { %847 = vmatmul.mubr.f32.vlgmr.msra.gmra.mrb[4].mxu0 %v491_v10 }
 0x1f5   :  { %849 = vmatprep.mubr.f32.mxu0 %v492_v11 }
 0x1f8   :  { %850 = vmatmul.mubr.f32.gmra.mrb[6].mxu0 %v493_v12 }
 0x2c7   :  { %v848_v17 = vpop.f32.mrb[4].mxu0 }
 0x2c8   :  { %v590_v18 = vadd.f32 %v848_v17, %v506_v15  ;;  %v584_v19 = vpop.f32.mrb[5].mxu0 }
 0x2c9   :  { %v585_v20 = vadd.f32 %v584_v19, %v501_v16 }
 0x2ca   :  { %956 = vtanh.f32 %v590_v18 }
 0x2cb   :  { %958 = vtanh.f32 %v585_v20  ;;  %v851_v22 = vpop.f32.mrb[6].mxu0 }
 0x2cc   :  { %v600_v24 = vadd.f32 %v851_v22, %v516_v21  ;;  %v594_v25 = vpop.f32.mrb[7].mxu0 }
 0x2cd   :  { %v595_v26 = vadd.f32 %v594_v25, %v511_v23 }
 0x2ce   :  { %960 = vtanh.f32 %v600_v24 }
 0x2cf   :  { %962 = vtanh.f32 %v595_v26 }
 0x2d4   :  { %v957_v27 = vpop.eup %956 }
 0x2d5   :  { %v959_v28 = vpop.eup %958 }
 0x2d6   :  { %v904_v29 = vpack.c.bf16 %v957_v27, %v959_v28 }
 0x2d8   :  { %v961_v30 = vpop.eup %960  ;;  %905 = vmatpush3.bf16.msra.mxu1 %v904_v29 }
 0x2d9   :  { %v963_v31 = vpop.eup %962  ;;  %906 = vmatprep.subr.bf16.mxu1 %v989_v13 }
 0x2da   :  { %v907_v32 = vpack.c.bf16 %v961_v30, %v963_v31 }
 0x2dc   :  { %908 = vmatpush3.bf16.msra.mxu1 %v907_v32 }
 0x2df   :  { %861 = vmatmul.mubr.msk.f32.vlgmr.msra.gmra.mrb[16].mxu1 %vm280_vm2, %v607_v33 }
 0x3b2   :  { %v683_v35 = vpop.f32.mrb[16].mxu1 }
 0x3b3   :  { %v684_v36 = vadd.f32 %v683_v35, %v612_v34  ;;  %v862_v37 = vpop.f32.mrb[17].mxu1 }
 0x3b5   :  { %687 = vst [vmem:[#allocation2] sm:$0x7] %v684_v36 }
 0x3b6   :  { %975 = shalt.err (!%p972_p4)
}
 0x3b7   :  { %s976_s7 = scalar_lea.hbm %s1238_s9, 64 }
 0x3b8   :  { %p977_p5 = scmp.ne.s32.totalorder %s1238_s9, %s976_s7  ;;  %p980_p6 = scmp.lt.u32.totalorder %s976_s7, %s1238_s9 }
 0x3ba   :  { %p982_p7 = pnand %p980_p6, %p977_p5 }
 0x3bc   :  { %985 = shalt.err (!%p982_p7)
}
 0x3bd   :  { %697 = dma.vmem_to_hbm [thread:$0]  %s695_s30, 64, %s1238_s9, [#allocation3]  }
 0x3be   :  { %986 = dma.done.wait [#allocation3], 64  }
 0x3bf   :  { %987 = vsyncadd [#allocation3], 4294967232 }
 0x3c0   :  { %701 = vsyncpa [#allocation3], 1 }

</bundles_post_ra>
